<compile_context>
chip_gen: v7x
topology: tpu7x:2x2x1
jax: 0.10.0
libtpu: 0.0.40
codegen_flags: <defaults>
</compile_context>

<pallas_src>
import math

import jax
import jax.numpy as jnp
from jax.experimental import pallas as pl
from jax.experimental.pallas import tpu as pltpu


def timestep_embedder_kernel(t_ref, freqs_ref, w1c_ref, w1s_ref, b1_ref,
                             w2_ref, b2_ref, out_ref):
    # Sinusoidal embedding: args = t[:, None] * freqs[None]   -> (TM, half)
    t = t_ref[...]                        # (TM, 1)   f32
    freqs = freqs_ref[...]                # (1, half) f32
    args = t * freqs                      # (TM, half) broadcast outer product

    # Split-matmul replaces concat([cos, sin]) @ w1 :
    #   h = cos(args) @ w1[:half] + sin(args) @ w1[half:] + b1
    cos_a = jnp.cos(args).astype(jnp.bfloat16)
    sin_a = jnp.sin(args).astype(jnp.bfloat16)
    h = (jnp.dot(cos_a, w1c_ref[...], preferred_element_type=jnp.float32)
         + jnp.dot(sin_a, w1s_ref[...], preferred_element_type=jnp.float32)
         + b1_ref[...])                   # f32

    # SiLU in f32 (native VPU/EUP path on all generations).
    h = h * jax.nn.sigmoid(h)

    # Second Linear: bf16 operands, f32 accumulation.
    y = jnp.dot(h.astype(jnp.bfloat16), w2_ref[...],
                preferred_element_type=jnp.float32) + b2_ref[...]
    out_ref[...] = y.astype(out_ref.dtype)


def timestep_embedder(t, freqs, w1_cos, w1_sin, b1, w2, b2, *, tm=128):
    """t: (N,) float32. Returns (N, hidden) float32."""
    N = t.shape[0]
    half = freqs.shape[1]
    H = w2.shape[1]

    # Choose the M tile: full tiles of `tm` for large N, otherwise a single
    # sublane-padded tile (block second-to-last dim must be a multiple of 8 or
    # equal the full array dim).
    if N >= tm:
        tm_eff = tm
        n_pad = pl.cdiv(N, tm_eff) * tm_eff
    else:
        n_pad = max(8, -(-N // 8) * 8)
        tm_eff = n_pad

    t2d = t.astype(jnp.float32).reshape(N, 1)
    if n_pad != N:
        t2d = jnp.pad(t2d, ((0, n_pad - N), (0, 0)))

    grid = (n_pad // tm_eff,)

    out = pl.pallas_call(
        timestep_embedder_kernel,
        out_shape=jax.ShapeDtypeStruct((n_pad, H), jnp.float32),
        grid_spec=pltpu.PrefetchScalarGridSpec(
            num_scalar_prefetch=0,
            grid=grid,
            in_specs=[
                pl.BlockSpec((tm_eff, 1), lambda i: (i, 0)),    # t   (tiled)
                pl.BlockSpec((1, half), lambda i: (0, 0)),      # freqs (resident)
                pl.BlockSpec((half, H), lambda i: (0, 0)),      # w1_cos
                pl.BlockSpec((half, H), lambda i: (0, 0)),      # w1_sin
                pl.BlockSpec((1, H), lambda i: (0, 0)),         # b1
                pl.BlockSpec((H, H), lambda i: (0, 0)),         # w2
                pl.BlockSpec((1, H), lambda i: (0, 0)),         # b2
            ],
            out_specs=pl.BlockSpec((tm_eff, H), lambda i: (i, 0)),
        ),
        compiler_params=pltpu.CompilerParams(
            dimension_semantics=("parallel",),   # shards N-grid across v7x TCs
        ),
    )(t2d, freqs, w1_cos, w1_sin, b1, w2, b2)

    return out[:N]


def make_params(key, frequency_embedding_size, hidden_size):
    half = frequency_embedding_size // 2
    # freqs = exp(-log(max_period) * arange(half) / half)
    freqs = jnp.exp(
        -math.log(10000.0) * jnp.arange(half, dtype=jnp.float32) / half
    ).reshape(1, half)
    k1, k2, k3, k4 = jax.random.split(key, 4)
    # Deterministic synthetic init (shapes match nn.Linear(F, H) and nn.Linear(H, H)),
    # stored input-major so the kernel does x @ W + b.
    w1 = jax.random.normal(k1, (frequency_embedding_size, hidden_size),
                           jnp.float32) * 0.02
    b1 = jax.random.normal(k2, (1, hidden_size), jnp.float32) * 0.02
    w2 = jax.random.normal(k3, (hidden_size, hidden_size), jnp.float32) * 0.02
    b2 = jax.random.normal(k4, (1, hidden_size), jnp.float32) * 0.02
    # Weights in bf16 for single-pass MXU matmuls and halved weight DMA bytes;
    # biases stay f32 (added after f32 accumulation).
    w1_cos = w1[:half].astype(jnp.bfloat16)
    w1_sin = w1[half:].astype(jnp.bfloat16)
    w2_bf16 = w2.astype(jnp.bfloat16)
    return freqs, w1_cos, w1_sin, b1, w2_bf16, b2


def reference(t, freqs, w1_cos, w1_sin, b1, w2, b2):
    # Pure-JAX reference using the same (bf16-stored) weights, computed in f32.
    args = t.astype(jnp.float32)[:, None] * freqs[0][None, :]
    emb = jnp.concatenate([jnp.cos(args), jnp.sin(args)], axis=-1)
    w1 = jnp.concatenate([w1_cos, w1_sin], axis=0).astype(jnp.float32)
    # NOTE: frequency_embedding_size is even, so the odd-dim zero-pad branch
    # of timestep_embedding is statically dead here.
    h = emb @ w1 + b1
    h = h * jax.nn.sigmoid(h)
    return h @ w2.astype(jnp.float32) + b2


if __name__ == "__main__":
    N = 8                               # batch of timesteps
    frequency_embedding_size = 256      # must be even (no odd-pad branch)
    hidden_size = 128

    key = jax.random.PRNGKey(0)
    kp, kt = jax.random.split(key)
    freqs, w1_cos, w1_sin, b1, w2, b2 = make_params(
        kp, frequency_embedding_size, hidden_size)
    t = jax.random.uniform(kt, (N,), jnp.float32, 0.0, 1000.0)

    out = timestep_embedder(t, freqs, w1_cos, w1_sin, b1, w2, b2)
    out = jax.block_until_ready(out)

    ref = reference(t, freqs, w1_cos, w1_sin, b1, w2, b2)
    assert out.shape == (N, hidden_size)
    # bf16 matmul operands -> looser tolerance than the pure-f32 version.
    assert jnp.allclose(out, ref, atol=3e-2, rtol=3e-2), "mismatch vs reference"

    print("KERNEL_OK")
</pallas_src>

<mosaic_0001>
module attributes {stable_mosaic.version = 11 : i64} {
  func.func @timestep_embedder_kernel(%arg0: i32, %arg1: memref<8x1xf32, #tpu.memory_space<vmem>>, %arg2: memref<1x128xf32, #tpu.memory_space<vmem>>, %arg3: memref<128x128xbf16, #tpu.memory_space<vmem>>, %arg4: memref<128x128xbf16, #tpu.memory_space<vmem>>, %arg5: memref<1x128xf32, #tpu.memory_space<vmem>>, %arg6: memref<128x128xbf16, #tpu.memory_space<vmem>>, %arg7: memref<1x128xf32, #tpu.memory_space<vmem>>, %arg8: memref<8x128xf32, #tpu.memory_space<vmem>>) attributes {dimension_semantics = [#tpu.dimension_semantics<parallel>], iteration_bounds = array<i64: 1>, scalar_prefetch = 0 : i64, scratch_operands = 0 : i64, tpu.core_type = #tpu.core_type<tc>, window_params = [{transform_indices = @transform_0, window_bounds = array<i64: 8, 1>}, {pipeline_mode = #tpu.pipeline_mode<synchronous>, transform_indices = @transform_1, window_bounds = array<i64: 1, 128>}, {pipeline_mode = #tpu.pipeline_mode<synchronous>, transform_indices = @transform_2, window_bounds = array<i64: 128, 128>}, {pipeline_mode = #tpu.pipeline_mode<synchronous>, transform_indices = @transform_3, window_bounds = array<i64: 128, 128>}, {pipeline_mode = #tpu.pipeline_mode<synchronous>, transform_indices = @transform_4, window_bounds = array<i64: 1, 128>}, {pipeline_mode = #tpu.pipeline_mode<synchronous>, transform_indices = @transform_5, window_bounds = array<i64: 128, 128>}, {pipeline_mode = #tpu.pipeline_mode<synchronous>, transform_indices = @transform_6, window_bounds = array<i64: 1, 128>}, {transform_indices = @transform_7, window_bounds = array<i64: 8, 128>}]} {
    %c0 = arith.constant 0 : index
    %c0_0 = arith.constant 0 : index
    %0 = vector.load %arg1[%c0, %c0_0] : memref<8x1xf32, #tpu.memory_space<vmem>>, vector<8x1xf32>
    %c0_1 = arith.constant 0 : index
    %c0_2 = arith.constant 0 : index
    %1 = vector.load %arg2[%c0_1, %c0_2] : memref<1x128xf32, #tpu.memory_space<vmem>>, vector<1x128xf32>
    %2 = vector.broadcast %0 : vector<8x1xf32> to vector<8x128xf32>
    %3 = vector.broadcast %1 : vector<1x128xf32> to vector<8x128xf32>
    %4 = arith.mulf %2, %3 : vector<8x128xf32>
    %5 = math.cos %4 : vector<8x128xf32>
    %6 = arith.truncf %5 : vector<8x128xf32> to vector<8x128xbf16>
    %7 = math.sin %4 : vector<8x128xf32>
    %8 = arith.truncf %7 : vector<8x128xf32> to vector<8x128xbf16>
    %c0_3 = arith.constant 0 : index
    %c0_4 = arith.constant 0 : index
    %9 = vector.load %arg3[%c0_3, %c0_4] : memref<128x128xbf16, #tpu.memory_space<vmem>>, vector<128x128xbf16>
    %cst = arith.constant dense<0.000000e+00> : vector<8x128xf32>
    %10 = tpu.matmul %6, %9, %cst {dimension_numbers = #tpu.dot_dimension_numbers<[1], [0], [0], [1], [0, 0, 1, 1], [], []>} : vector<8x128xbf16>, vector<128x128xbf16>, vector<8x128xf32> -> vector<8x128xf32>
    %c0_5 = arith.constant 0 : index
    %c0_6 = arith.constant 0 : index
    %11 = vector.load %arg4[%c0_5, %c0_6] : memref<128x128xbf16, #tpu.memory_space<vmem>>, vector<128x128xbf16>
    %cst_7 = arith.constant dense<0.000000e+00> : vector<8x128xf32>
    %12 = tpu.matmul %8, %11, %cst_7 {dimension_numbers = #tpu.dot_dimension_numbers<[1], [0], [0], [1], [0, 0, 1, 1], [], []>} : vector<8x128xbf16>, vector<128x128xbf16>, vector<8x128xf32> -> vector<8x128xf32>
    %13 = arith.addf %10, %12 : vector<8x128xf32>
    %c0_8 = arith.constant 0 : index
    %c0_9 = arith.constant 0 : index
    %14 = vector.load %arg5[%c0_8, %c0_9] : memref<1x128xf32, #tpu.memory_space<vmem>>, vector<1x128xf32>
    %15 = vector.broadcast %14 : vector<1x128xf32> to vector<8x128xf32>
    %16 = arith.addf %13, %15 : vector<8x128xf32>
    %17 = arith.negf %16 : vector<8x128xf32>
    %18 = math.exp %17 : vector<8x128xf32>
    %cst_10 = arith.constant 1.000000e+00 : f32
    %19 = vector.broadcast %cst_10 : f32 to vector<8x128xf32>
    %20 = arith.addf %19, %18 : vector<8x128xf32>
    %21 = arith.divf %19, %20 : vector<8x128xf32>
    %22 = arith.mulf %16, %21 : vector<8x128xf32>
    %23 = arith.truncf %22 : vector<8x128xf32> to vector<8x128xbf16>
    %c0_11 = arith.constant 0 : index
    %c0_12 = arith.constant 0 : index
    %24 = vector.load %arg6[%c0_11, %c0_12] : memref<128x128xbf16, #tpu.memory_space<vmem>>, vector<128x128xbf16>
    %cst_13 = arith.constant dense<0.000000e+00> : vector<8x128xf32>
    %25 = tpu.matmul %23, %24, %cst_13 {dimension_numbers = #tpu.dot_dimension_numbers<[1], [0], [0], [1], [0, 0, 1, 1], [], []>} : vector<8x128xbf16>, vector<128x128xbf16>, vector<8x128xf32> -> vector<8x128xf32>
    %c0_14 = arith.constant 0 : index
    %c0_15 = arith.constant 0 : index
    %26 = vector.load %arg7[%c0_14, %c0_15] : memref<1x128xf32, #tpu.memory_space<vmem>>, vector<1x128xf32>
    %27 = vector.broadcast %26 : vector<1x128xf32> to vector<8x128xf32>
    %28 = arith.addf %25, %27 : vector<8x128xf32>
    %c0_16 = arith.constant 0 : index
    %c0_17 = arith.constant 0 : index
    %29 = vector.load %arg8[%c0_16, %c0_17] : memref<8x128xf32, #tpu.memory_space<vmem>>, vector<8x128xf32>
    tpu.vector_store %arg8[%c0_16, %c0_17], %28 {strides = array<i32>} : memref<8x128xf32, #tpu.memory_space<vmem>>, vector<8x128xf32>,
    return
  }
  func.func @transform_0(%arg0: i32) -> (i32, i32) {
    %c0_i32 = arith.constant 0 : i32
    %c0_i32_0 = arith.constant 0 : i32
    return %arg0, %c0_i32 : i32, i32
  }
  func.func @transform_1(%arg0: i32) -> (i32, i32) {
    %c0_i32 = arith.constant 0 : i32
    %c0_i32_0 = arith.constant 0 : i32
    %c0_i32_1 = arith.constant 0 : i32
    return %c0_i32, %c0_i32_0 : i32, i32
  }
  func.func @transform_2(%arg0: i32) -> (i32, i32) {
    %c0_i32 = arith.constant 0 : i32
    %c0_i32_0 = arith.constant 0 : i32
    %c0_i32_1 = arith.constant 0 : i32
    return %c0_i32, %c0_i32_0 : i32, i32
  }
  func.func @transform_3(%arg0: i32) -> (i32, i32) {
    %c0_i32 = arith.constant 0 : i32
    %c0_i32_0 = arith.constant 0 : i32
    %c0_i32_1 = arith.constant 0 : i32
    return %c0_i32, %c0_i32_0 : i32, i32
  }
  func.func @transform_4(%arg0: i32) -> (i32, i32) {
    %c0_i32 = arith.constant 0 : i32
    %c0_i32_0 = arith.constant 0 : i32
    %c0_i32_1 = arith.constant 0 : i32
    return %c0_i32, %c0_i32_0 : i32, i32
  }
  func.func @transform_5(%arg0: i32) -> (i32, i32) {
    %c0_i32 = arith.constant 0 : i32
    %c0_i32_0 = arith.constant 0 : i32
    %c0_i32_1 = arith.constant 0 : i32
    return %c0_i32, %c0_i32_0 : i32, i32
  }
  func.func @transform_6(%arg0: i32) -> (i32, i32) {
    %c0_i32 = arith.constant 0 : i32
    %c0_i32_0 = arith.constant 0 : i32
    %c0_i32_1 = arith.constant 0 : i32
    return %c0_i32, %c0_i32_0 : i32, i32
  }
  func.func @transform_7(%arg0: i32) -> (i32, i32) {
    %c0_i32 = arith.constant 0 : i32
    %c0_i32_0 = arith.constant 0 : i32
    return %arg0, %c0_i32 : i32, i32
  }
}

</mosaic_0001>

<bundles_post_ra>
// kernel: tpu_custom_call.1
= control target key start
LH: loop header
LB: loop body
LE: loop exit
PB: predicated region body
PF: predicated region fallthrough
CT: control target
= control target key end

     0   :  { %12 = vsyncpa [#allocation3], 0  ;;  %s1095_s0 = inlined_call_operand.vmem [shape: f32[8,1], index: 0, kind: input, shape index: {}]   ;;  %s1096_s1 = inlined_call_operand.vmem [shape: f32[1,128], index: 1, kind: input, shape index: {}]   ;;  %s1097_s2 = inlined_call_operand.hbm [shape: bf16[128,128], index: 2, kind: input, shape index: {}]   ;;  %s1098_s3 = inlined_call_operand.hbm [shape: bf16[128,128], index: 3, kind: input, shape index: {}]   ;;  %s1099_s4 = inlined_call_operand.vmem [shape: f32[1,128], index: 4, kind: input, shape index: {}]   ;;  %s1100_s5 = inlined_call_operand.hbm [shape: bf16[128,128], index: 5, kind: input, shape index: {}]   ;;  %s1101_s6 = inlined_call_operand.vmem [shape: f32[1,128], index: 6, kind: input, shape index: {}]   ;;  %s1102_s7 = inlined_call_operand.hbm [shape: f32[8,128], index: 7, kind: output, shape index: {}]  }
   0x1   :  { %13 = vsyncpa [#allocation6], 0 }
   0x2   :  { %14 = vsyncpa [#allocation4], 0  ;;  %s913_s24 = smov [#allocation5]   ;;  %s914_s26 = smov [#allocation2]  }
   0x3   :  { %s36_s25 = sshll.u32 %s913_s24, 4  ;;  %s24_s27 = sshll.u32 %s914_s26, 4  ;;  %s37_s25 = int_to_ptr.vmem [resolvable:$true] %s36_s25  ;;  %s968_s27 = int_to_ptr.vmem [resolvable:$true] %s24_s27 }
   0x4   :  { %s819_s30 = scalar_lea.hbm %s1098_s3, 1024 }
   0x5   :  { %p820_p0 = scmp.ne.s32.totalorder %s1098_s3, %s819_s30  ;;  %p823_p1 = scmp.lt.u32.totalorder %s819_s30, %s1098_s3 }
   0x7   :  { %p825_p2 = pnand %p823_p1, %p820_p0 }
   0x9   :  { %828 = shalt.err (!%p825_p2)
}
   0xa   :  { %s829_s12 = scalar_lea.vmem %s37_s25, 1024  ;;  %p834_p4 = scmp.lt.s32.totalorder %s37_s25, %s37_s25 }
   0xb   :  { %p830_p3 = scmp.ne.s32.totalorder %s37_s25, %s829_s12  ;;  %p835_p5 = scmp.lt.s32.totalorder %s829_s12, %s829_s12 }
   0xd   :  { %p836_p6 = por %p835_p5, %p834_p4 }
   0xf   :  { %p837_p7 = pnand %p836_p6, %p830_p3 }
  0x11   :  { %840 = shalt.err (!%p837_p7)
}
  0x12   :  { %s915_s13 = smov 64   ;;  %s916_s14 = smov 4  }
  0x13   :  { %42 = dma.hbm_to_vmem [thread:$0]  %s1098_s3, 1024, %s37_s25, [#allocation6], %s915_s13, %s915_s13, %s916_s14  }
  0x14   :  { %s841_s19 = scalar_lea.hbm %s1097_s2, 1024 }
  0x15   :  { %p842_p8 = scmp.ne.s32.totalorder %s1097_s2, %s841_s19  ;;  %p845_p9 = scmp.lt.u32.totalorder %s841_s19, %s1097_s2 }
  0x17   :  { %p847_p10 = pnand %p845_p9, %p842_p8 }
  0x19   :  { %850 = shalt.err (!%p847_p10)
}
  0x1a   :  { %s851_s24 = scalar_lea.vmem %s968_s27, 1024  ;;  %p856_p12 = scmp.lt.s32.totalorder %s968_s27, %s968_s27 }
  0x1b   :  { %p852_p11 = scmp.ne.s32.totalorder %s968_s27, %s851_s24  ;;  %p857_p13 = scmp.lt.s32.totalorder %s851_s24, %s851_s24 }
  0x1d   :  { %p858_p0 = por %p857_p13, %p856_p12 }
  0x1f   :  { %p859_p1 = pnand %p858_p0, %p852_p11 }
  0x21   :  { %862 = shalt.err (!%p859_p1)
}
  0x22   :  { %30 = dma.hbm_to_vmem [thread:$0]  %s1097_s2, 1024, %s968_s27, [#allocation3], %s915_s13, %s915_s13, %s916_s14  }
  0x23   :  { %s917_s26 = smov [#allocation7]   ;;  %s863_s8 = scalar_lea.hbm %s1100_s5, 1024 }
  0x24   :  { %s50_s28 = sshll.u32 %s917_s26, 4  ;;  %p864_p2 = scmp.ne.s32.totalorder %s1100_s5, %s863_s8  ;;  %s51_s28 = int_to_ptr.vmem [resolvable:$true] %s50_s28 }
  0x25   :  { %p867_p3 = scmp.lt.u32.totalorder %s863_s8, %s1100_s5 }
  0x27   :  { %p869_p4 = pnand %p867_p3, %p864_p2 }
  0x29   :  { %872 = shalt.err (!%p869_p4)
}
  0x2a   :  { %s873_s15 = scalar_lea.vmem %s51_s28, 1024  ;;  %p878_p6 = scmp.lt.s32.totalorder %s51_s28, %s51_s28 }
  0x2b   :  { %p874_p5 = scmp.ne.s32.totalorder %s51_s28, %s873_s15  ;;  %p879_p7 = scmp.lt.s32.totalorder %s873_s15, %s873_s15 }
  0x2d   :  { %p880_p8 = por %p879_p7, %p878_p6 }
  0x2f   :  { %p881_p9 = pnand %p880_p8, %p874_p5 }
  0x31   :  { %884 = shalt.err (!%p881_p9)
}
  0x32   :  { %56 = dma.hbm_to_vmem [thread:$0]  %s1100_s5, 1024, %s51_s28, [#allocation6], %s915_s13, %s915_s13, %s916_s14  }
  0x33   :  { %907 = dma.done.wait [#allocation3], 1024  }
  0x34   :  { %908 = vsyncadd [#allocation3], 4294966272 }
  0x35   :  { %909 = dma.done.wait [#allocation6], 2048  }
  0x36   :  { %910 = vsyncadd [#allocation6], 4294965248  ;;  %v918_v0 = vmov 0   ;;  %v69_v1 = vld [vmem:[%s1095_s0] sm:$0xff]  ;;  %v919_v4 = vmov 0.0   ;;  %v789_v5 = vld [vmem:[#allocation5 + $0x8] sm:$0xff]  }
  0x37   :  { %786 = vset.pattern.permute.xlu0 %v918_v0  ;;  %v787_v2 = vld [vmem:[#allocation5] sm:$0xff]   ;;  %707 = vmatprep.subr.bf16.mxu0 %v919_v4  ;;  %v790_v6 = vld [vmem:[#allocation2 + $0x8] sm:$0xff]   ;;  %v791_v7 = vld [vmem:[#allocation5 + $0x10] sm:$0xff]   ;;  %vm920_vm0 = vmmov 0   ;;  %v921_v32 = vmov 683565275  }
  0x38   :  { %73 = vperm.xlu0 %786, %v69_v1   ;;  %v788_v3 = vld [vmem:[#allocation2] sm:$0xff]   ;;  %727 = vmatprep.subr.bf16.mxu1 %v919_v4  ;;  %v792_v8 = vld [vmem:[#allocation2 + $0x10] sm:$0xff]   ;;  %v793_v9 = vld [vmem:[#allocation5 + $0x18] sm:$0xff]   ;;  %v922_v34 = vmov 2475754826  }
  0x39   :  { %708 = vmatpush3.bf16.msra.mxu0 %v787_v2  ;;  %728 = vmatpush3.bf16.msra.mxu1 %v788_v3  ;;  %v794_v10 = vld [vmem:[#allocation2 + $0x18] sm:$0xff]   ;;  %v795_v11 = vld [vmem:[#allocation5 + $0x20] sm:$0xff]   ;;  %v797_v13 = vld [vmem:[#allocation5 + $0x28] sm:$0xff]   ;;  %v923_v37 = vmov 2131351028  }
  0x3a   :  { %709 = vmatprep.subr.bf16.mxu0 %v919_v4  ;;  %729 = vmatprep.subr.bf16.mxu1 %v919_v4  ;;  %v796_v12 = vld [vmem:[#allocation2 + $0x20] sm:$0xff]   ;;  %v798_v14 = vld [vmem:[#allocation2 + $0x28] sm:$0xff]   ;;  %v799_v15 = vld [vmem:[#allocation5 + $0x30] sm:$0xff]   ;;  %v924_v40 = vmov 2102212464  }
  0x3b   :  { %723 = vmatprep.mubr.msk.bf16.mxu0 %vm920_vm0, %v919_v4  ;;  %743 = vmatprep.mubr.msk.bf16.mxu1 %vm920_vm0, %v919_v4  ;;  %v800_v16 = vld [vmem:[#allocation2 + $0x30] sm:$0xff]   ;;  %v801_v17 = vld [vmem:[#allocation5 + $0x38] sm:$0xff]   ;;  %v644_v19 = vld [vmem:[%s1096_s1] ss:$0 sm:$0xff]  ;;  %v925_v43 = vmov 920167782  }
  0x3c   :  { %v802_v18 = vld [vmem:[#allocation2 + $0x38] sm:$0xff]   ;;  %v926_v46 = vmov 1326507024  }
  0x3d   :  { %710 = vmatpush3.bf16.msra.mxu0 %v789_v5  ;;  %730 = vmatpush3.bf16.msra.mxu1 %v790_v6 }
  0x3e   :  { %711 = vmatprep.subr.bf16.mxu0 %v919_v4  ;;  %731 = vmatprep.subr.bf16.mxu1 %v919_v4 }
  0x41   :  { %712 = vmatpush3.bf16.msra.mxu0 %v791_v7  ;;  %732 = vmatpush3.bf16.msra.mxu1 %v792_v8 }
  0x42   :  { %713 = vmatprep.subr.bf16.mxu0 %v919_v4  ;;  %733 = vmatprep.subr.bf16.mxu1 %v919_v4 }
  0x45   :  { %714 = vmatpush3.bf16.msra.mxu0 %v793_v9  ;;  %734 = vmatpush3.bf16.msra.mxu1 %v794_v10 }
  0x46   :  { %715 = vmatprep.subr.bf16.mxu0 %v919_v4  ;;  %735 = vmatprep.subr.bf16.mxu1 %v919_v4 }
  0x49   :  { %716 = vmatpush3.bf16.msra.mxu0 %v795_v11  ;;  %736 = vmatpush3.bf16.msra.mxu1 %v796_v12 }
  0x4a   :  { %717 = vmatprep.subr.bf16.mxu0 %v919_v4  ;;  %737 = vmatprep.subr.bf16.mxu1 %v919_v4 }
  0x4d   :  { %718 = vmatpush3.bf16.msra.mxu0 %v797_v13  ;;  %738 = vmatpush3.bf16.msra.mxu1 %v798_v14 }
  0x4e   :  { %719 = vmatprep.subr.bf16.mxu0 %v919_v4  ;;  %739 = vmatprep.subr.bf16.mxu1 %v919_v4 }
  0x51   :  { %720 = vmatpush3.bf16.msra.mxu0 %v799_v15  ;;  %740 = vmatpush3.bf16.msra.mxu1 %v800_v16 }
  0x52   :  { %721 = vmatprep.subr.bf16.mxu0 %v919_v4  ;;  %741 = vmatprep.subr.bf16.mxu1 %v919_v4 }
  0x55   :  { %722 = vmatpush3.bf16.msra.mxu0 %v801_v17  ;;  %742 = vmatpush3.bf16.msra.mxu1 %v802_v18 }
  0x56   :  { %747 = vmatprep.subr.bf16.mxu0 %v919_v4 }
  0xb7   :  { %v74_v20 = vpop.permute.xlu0 %73 }
  0xb8   :  { %v1047_v21 = vmul.f32 %v644_v19, %v74_v20 }
  0xba   :  { %v86_v22 = vand.u32 2139095040, %v1047_v21  ;;  %v83_v26 = vand.u32 2147483647, %v1047_v21  ;;  %vm85_vm8 = vcmp.lt.s32.totalorder %v1047_v21, 0 }
  0xbc   :  { %v87_v23 = vshrl.u32 %v86_v22, 23  ;;  %v90_v29 = vand.u32 8388607, %v83_v26  ;;  %vm84_vm9 = vcmp.le.f32.partialorder %v83_v26, 0.7853982 }
  0xbe   :  { %v645_v24 = vadd.s32 4294967169, %v87_v23  ;;  %v91_v48 = vor.u32 8388608, %v90_v29 }
  0xc0   :  { %v93_v25 = vadd.s32 1, %v645_v24  ;;  %v131_v62 = vshll.u32 %v91_v48, 8 }
  0xc2   :  { %vm94_vm1 = vcmp.gt.s32.totalorder %v93_v25, 0 }
  0xc3   :  { %v95_v27 = vsel %vm94_vm1, %v93_v25, 0  ;;  %vm175_vm1 = vweird.f32 %v1047_v21 }
  0xc4   :  { %v97_v28 = vand.u32 31, %v95_v27  ;;  %v96_v31 = vshrl.u32 %v95_v27, 5 }
  0xc6   :  { %v98_v30 = vsub.s32 32, %v97_v28  ;;  %v100_v33 = vshll.u32 %v921_v32, %v97_v28  ;;  %v103_v35 = vshll.u32 %v922_v34, %v97_v28  ;;  %v106_v39 = vshll.u32 %v923_v37, %v97_v28 }
  0xc7   :  { %v109_v42 = vshll.u32 %v924_v40, %v97_v28  ;;  %v112_v45 = vshll.u32 %v925_v43, %v97_v28  ;;  %vm115_vm2 = vcmp.lt.s32.totalorder %v96_v31, 1  ;;  %vm118_vm3 = vcmp.lt.s32.totalorder %v96_v31, 4 }
  0xc8   :  { %v101_v36 = vshrl.u32 %v922_v34, %v98_v30  ;;  %v104_v38 = vshrl.u32 %v923_v37, %v98_v30  ;;  %v107_v41 = vshrl.u32 %v924_v40, %v98_v30  ;;  %v110_v44 = vshrl.u32 %v925_v43, %v98_v30 }
  0xc9   :  { %v113_v47 = vshrl.u32 %v926_v46, %v98_v30  ;;  %v99_v57 = vshrl.u32 %v921_v32, %v98_v30  ;;  %vm117_vm4 = vcmp.lt.s32.totalorder %v96_v31, 3  ;;  %vm116_vm5 = vcmp.lt.s32.totalorder %v96_v31, 2 }
  0xca   :  { %v102_v49 = vor.u32 %v101_v36, %v100_v33  ;;  %v105_v50 = vor.u32 %v104_v38, %v103_v35  ;;  %v108_v51 = vor.u32 %v107_v41, %v106_v39  ;;  %v111_v52 = vor.u32 %v110_v44, %v109_v42 }
  0xcb   :  { %v114_v53 = vor.u32 %v113_v47, %v112_v45 }
  0xcc   :  { %v120_v54 = vsel %vm118_vm3, %v108_v51, 2102212464  ;;  %v123_v55 = vsel %vm115_vm2, %v102_v49, %v105_v50  ;;  %v127_v56 = vsel %vm115_vm2, %v105_v50, %v108_v51  ;;  %v124_v58 = vsel %vm118_vm3, %v111_v52, 920167782 }
  0xcd   :  { %v128_v59 = vsel %vm118_vm3, %v114_v53, 1326507024  ;;  %v125_v60 = vsel %vm117_vm4, %v108_v51, %v124_v58  ;;  %v119_v63 = vsel %vm115_vm2, %v99_v57, %v102_v49  ;;  %v121_v0 = vsel %vm117_vm4, %v105_v50, %v120_v54  ;;  %v803_v58 = vld [vmem:[#allocation7] sm:$0xff]  }
  0xce   :  { %v129_v61 = vsel %vm117_vm4, %v111_v52, %v128_v59  ;;  %v126_v1 = vsel %vm116_vm5, %v123_v55, %v125_v60  ;;  %v122_v8 = vsel %vm116_vm5, %v119_v63, %v121_v0  ;;  %v804_v59 = vld [vmem:[#allocation7 + $0x8] sm:$0xff]   ;;  %v806_v60 = vld [vmem:[#allocation7 + $0x18] sm:$0xff]   ;;  %v809_v63 = vld [vmem:[#allocation7 + $0x30] sm:$0xff]  }
  0xcf   :  { %v130_v2 = vsel %vm116_vm5, %v127_v56, %v129_v61  ;;  %v1056_v6 = vmul.u32.u64.low %v131_v62, %v126_v1  ;;  %v1057_v7 = vmul.u32.u64.high %v131_v62, %v126_v1, %v1056_v6  ;;  %v138_v10 = vmul.u32 %v131_v62, %v122_v8  ;;  %v807_v61 = vld [vmem:[#allocation7 + $0x20] sm:$0xff]   ;;  %v810_v0 = vld [vmem:[#allocation7 + $0x38] sm:$0xff]  }
  0xd0   :  { %v1053_v3 = vmul.u32.u64.low %v131_v62, %v130_v2  ;;  %v1054_v5 = vmul.u32.u64.high %v131_v62, %v130_v2, %v1053_v3  ;;  %v808_v62 = vld [vmem:[#allocation7 + $0x28] sm:$0xff]  }
  0xd1   :  { %v141_v9 = vadd.s32 1, %v1057_v7  ;;  %v669_v3 = vld [vmem:[%s1099_s4] ss:$0 sm:$0xff]  ;;  %s927_s4 = smov [#allocation8]  }
  0xd2   :  { %vm140_vm6 = vc.u32 %v1054_v5, %v1056_v6  ;;  %v139_v23 = vadd.s32 %v1056_v6, %v1054_v5  ;;  %s634_s19 = sshll.u32 %s927_s4, 4  ;;  %s635_s19 = int_to_ptr.vmem [resolvable:$true] %s634_s19 }
  0xd3   :  { %v142_v11 = vsel %vm140_vm6, %v141_v9, %v1057_v7  ;;  %s885_s20 = scalar_lea.vmem %s635_s19, 128  ;;  %p890_p11 = scmp.lt.s32.totalorder %s635_s19, %s635_s19 }
  0xd4   :  { %v143_v12 = vadd.s32 %v142_v11, %v138_v10  ;;  %p886_p10 = scmp.ne.s32.totalorder %s635_s19, %s885_s20  ;;  %p891_p12 = scmp.lt.s32.totalorder %s885_s20, %s885_s20 }
  0xd6   :  { %v144_v13 = vadd.s32 536870912, %v143_v12  ;;  %p892_p13 = por %p891_p12, %p890_p11 }
  0xd8   :  { %v145_v14 = vshrl.u32 %v144_v13, 30  ;;  %p893_p0 = pnand %p892_p13, %p886_p10 }
  0xda   :  { %v146_v15 = vshll.u32 %v145_v14, 30  ;;  %v169_v36 = vsub.s32 4, %v145_v14 }
  0xdc   :  { %v147_v16 = vsub.s32 %v143_v12, %v146_v15  ;;  %v170_v39 = vsel %vm85_vm8, %v169_v36, %v145_v14 }
  0xdd   :  { %v172_v41 = vsel %vm84_vm9, 0, %v170_v39 }
  0xde   :  { %v149_v17 = vsub.s32 0, %v147_v16  ;;  %v280_v42 = vadd.s32 3, %v172_v41  ;;  %v176_v44 = vand.u32 3, %v172_v41 }
  0xe0   :  { %v646_v18 = vmin.u32 %v149_v17, %v147_v16  ;;  %v281_v43 = vand.u32 3, %v280_v42  ;;  %vm181_vm11 = vcmp.eq.s32.totalorder %v176_v44, 2  ;;  %vm178_vm13 = vcmp.eq.s32.totalorder %v176_v44, 0 }
  0xe1   :  { %vm177_vm15 = vcmp.lt.s32.totalorder %v176_v44, 2 }
  0xe2   :  { %v151_v19 = vclz %v646_v18  ;;  %vm286_vm10 = vcmp.eq.s32.totalorder %v281_v43, 2  ;;  %vm283_vm12 = vcmp.eq.s32.totalorder %v281_v43, 0  ;;  %vm282_vm14 = vcmp.lt.s32.totalorder %v281_v43, 2  ;;  %v671_v18 = vld [vmem:[%s1101_s6] ss:$0 sm:$0xff] }
  0xe4   :  { %v647_v20 = vadd.s32 4294967294, %v151_v19 }
  0xe6   :  { %vm648_vm7 = vcmp.lt.s32.totalorder %v647_v20, 0 }
  0xe7   :  { %v154_v22 = vsel %vm648_vm7, 0, %v647_v20 }
  0xe8   :  { %v155_v24 = vsub.s32 32, %v154_v22  ;;  %v159_v25 = vsub.s32 4294967266, %v154_v22  ;;  %v156_v27 = vshll.u32 %v147_v16, %v154_v22 }
  0xea   :  { %v157_v28 = vshrl.u32 %v139_v23, %v155_v24  ;;  %v160_v29 = vadd.s32 127, %v159_v25 }
  0xec   :  { %v158_v30 = vor.u32 %v157_v28, %v156_v27  ;;  %v161_v31 = vshll.u32 %v160_v29, 23 }
  0xee   :  { %v162_v32 = vor.u32 4788187, %v161_v31  ;;  %v165_v34 = vcvt.s32.f32 %v158_v30 }
  0xf0   :  { %v163_v33 = vand.u32 2147483647, %v162_v32 }
  0xf2   :  { %v166_v35 = vmul.f32 %v165_v34, %v163_v33 }
  0xf4   :  { %v167_v37 = vxor.u32 2147483648, %v166_v35 }
  0xf6   :  { %v168_v38 = vsel %vm85_vm8, %v167_v37, %v166_v35 }
  0xf7   :  { %v171_v40 = vsel %vm84_vm9, %v1047_v21, %v168_v38  ;;  %v805_v21 = vld [vmem:[#allocation7 + $0x10] sm:$0xff]  }
  0xf8   :  { %811 = vcosq.f32 %v171_v40 }
  0xf9   :  { %813 = vsinq.f32 %v171_v40 }
 0x102   :  { %v812_v45 = vpop.eup %811 }
 0x103   :  { %v814_v46 = vpop.eup %813  ;;  %v182_v47 = vxor.u32 2147483648, %v812_v45 }
 0x104   :  { %v179_v48 = vxor.u32 2147483648, %v814_v46 }
 0x105   :  { %v288_v49 = vsel %vm286_vm10, %v182_v47, %v814_v46  ;;  %v183_v26 = vsel %vm181_vm11, %v182_v47, %v814_v46 }
 0x106   :  { %v285_v50 = vsel %vm283_vm12, %v812_v45, %v179_v48  ;;  %v180_v51 = vsel %vm178_vm13, %v812_v45, %v179_v48 }
 0x107   :  { %v289_v52 = vsel %vm282_vm14, %v285_v50, %v288_v49  ;;  %v184_v53 = vsel %vm177_vm15, %v180_v51, %v183_v26 }
 0x108   :  { %v290_v54 = vsel %vm175_vm1, nan, %v289_v52  ;;  %v185_v55 = vsel %vm175_vm1, nan, %v184_v53 }
 0x109   :  { %v291_v56 = vpack.c.bf16 %v290_v54, %v290_v54  ;;  %v186_v57 = vpack.c.bf16 %v185_v55, %v185_v55 }
 0x10b   :  { %724 = vmatmul.mubr.bf16.vlgmr.msra.gmra.mrb[0].mxu0 %v291_v56  ;;  %744 = vmatmul.mubr.bf16.vlgmr.msra.gmra.mrb[0].mxu1 %v186_v57 }
 0x10c   :  { %763 = vmatprep.mubr.msk.bf16.mxu0 %vm920_vm0, %v919_v4  ;;  %748 = vmatpush3.bf16.msra.mxu0 %v803_v58 }
 0x10d   :  { %749 = vmatprep.subr.bf16.mxu0 %v919_v4 }
 0x110   :  { %750 = vmatpush3.bf16.msra.mxu0 %v804_v59 }
 0x111   :  { %751 = vmatprep.subr.bf16.mxu0 %v919_v4 }
 0x114   :  { %752 = vmatpush3.bf16.msra.mxu0 %v805_v21 }
 0x115   :  { %753 = vmatprep.subr.bf16.mxu0 %v919_v4 }
 0x118   :  { %754 = vmatpush3.bf16.msra.mxu0 %v806_v60 }
 0x119   :  { %755 = vmatprep.subr.bf16.mxu0 %v919_v4 }
 0x11c   :  { %756 = vmatpush3.bf16.msra.mxu0 %v807_v61 }
 0x11d   :  { %757 = vmatprep.subr.bf16.mxu0 %v919_v4 }
 0x120   :  { %758 = vmatpush3.bf16.msra.mxu0 %v808_v62 }
 0x121   :  { %759 = vmatprep.subr.bf16.mxu0 %v919_v4 }
 0x124   :  { %760 = vmatpush3.bf16.msra.mxu0 %v809_v63 }
 0x125   :  { %761 = vmatprep.subr.bf16.mxu0 %v919_v4 }
 0x128   :  { %762 = vmatpush3.bf16.msra.mxu0 %v810_v0 }
 0x1de   :  { %v406_v1 = vpop.f32.mrb[0].mxu0  ;;  %v494_v2 = vpop.f32.mrb[0].mxu1 }
 0x1df   :  { %v495_v5 = vadd.f32 %v494_v2, %v406_v1  ;;  %v725_v6 = vpop.f32.mrb[1].mxu0  ;;  %v745_v7 = vpop.f32.mrb[1].mxu1 }
 0x1e0   :  { %v409_v8 = vpop.f32.mrb[2].mxu0  ;;  %v497_v9 = vpop.f32.mrb[2].mxu1 }
 0x1e1   :  { %v507_v10 = vadd.f32 %v669_v3, %v495_v5  ;;  %v726_v11 = vpop.f32.mrb[3].mxu0  ;;  %v746_v12 = vpop.f32.mrb[3].mxu1 }
 0x1e3   :  { %v670_v13 = vmul.f32 -1.442695, %v507_v10 }
 0x1e5   :  { %815 = vpow2.f32 %v670_v13 }
 0x1ef   :  { %v816_v14 = vpop.eup %815 }
 0x1f0   :  { %v511_v4 = vadd.f32 1.0, %v816_v14 }
 0x1f2   :  { %817 = vrcp.f32 %v511_v4 }
 0x1fc   :  { %v818_v15 = vpop.eup %817 }
 0x1fd   :  { %v514_v16 = vmul.f32 %v818_v15, %v507_v10 }
 0x1ff   :  { %v515_v17 = vpack.c.bf16 %v514_v16, %v514_v16 }
 0x201   :  { %764 = vmatmul.mubr.bf16.vlgmr.msra.gmra.mrb[4].mxu0 %v515_v17 }
 0x2d4   :  { %v621_v19 = vpop.f32.mrb[4].mxu0 }
 0x2d5   :  { %v622_v20 = vadd.f32 %v671_v18, %v621_v19  ;;  %v765_v22 = vpop.f32.mrb[5].mxu0 }
 0x2d6   :  { %v624_v23 = vpop.f32.mrb[6].mxu0 }
 0x2d7   :  { %627 = vst [vmem:[#allocation8] sm:$0xff] %v622_v20  ;;  %v766_v24 = vpop.f32.mrb[7].mxu0 }
 0x2d8   :  { %896 = shalt.err (!%p893_p0)
}
 0x2d9   :  { %s897_s6 = scalar_lea.hbm %s1102_s7, 128 }
 0x2da   :  { %p898_p1 = scmp.ne.s32.totalorder %s1102_s7, %s897_s6  ;;  %p901_p2 = scmp.lt.u32.totalorder %s897_s6, %s1102_s7 }
 0x2dc   :  { %p903_p3 = pnand %p901_p2, %p898_p1 }
 0x2de   :  { %906 = shalt.err (!%p903_p3)
}
 0x2df   :  { %637 = dma.vmem_to_hbm [thread:$0]  %s635_s19, 128, %s1102_s7, [#allocation4]  }
 0x2e0   :  { %911 = dma.done.wait [#allocation4], 128  }
 0x2e1   :  { %912 = vsyncadd [#allocation4], 4294967168 }
 0x2e2   :  { %641 = vsyncpa [#allocation3], 1 }
 0x2e3   :  { %642 = vsyncpa [#allocation6], 1 }
 0x2e4   :  { %643 = vsyncpa [#allocation4], 1 }

</bundles_post_ra>
